<compile_context>
chip_gen: v6e
topology: v6e:2x2x1
jax: 0.10.0
libtpu: 0.0.40
codegen_flags: <defaults>
</compile_context>

<pallas_src>
import functools

import jax
import jax.numpy as jnp
from jax.experimental import pallas as pl
from jax.experimental.pallas import tpu as pltpu


def _round_up(v, m):
    return ((v + m - 1) // m) * m


def _lily_kernel(x_ref, w_ref, b_ref, hp_ref, o_ref, *, apply_relu):
    # x_ref : (tm, in_dim)          current M-tile of tokens
    # w_ref : (in_dim, hidden_dim)  lp weight (transposed vs. PyTorch layout)
    # b_ref : (1, hidden_dim)       lp bias
    # hp_ref: (hidden_dim, out_dim) pre-reduced combined_hp (hoisted to wrapper)
    # o_ref : (tm, out_dim)
    hidden = jnp.dot(x_ref[...], w_ref[...],
                     preferred_element_type=jnp.float32) + b_ref[...]
    if apply_relu:
        hidden = jnp.maximum(hidden, 0.0)          # nn.ReLU (f32 on the VPU)
    hp = hp_ref[...]
    # Feed the tiny-K (K = adapter rank) second matmul in the param dtype:
    # no-op for f32, halves MXU passes for bf16 params. Accumulate in f32.
    hidden = hidden.astype(hp.dtype)
    o_ref[...] = jnp.dot(hidden, hp,
                         preferred_element_type=jnp.float32).astype(o_ref.dtype)


def _vmem_budget_bytes():
    """Per-generation VMEM budget, leaving ~25% headroom for compiler scratch."""
    try:
        cap = int(pltpu.get_tpu_info().vmem_capacity_bytes)
    except Exception:
        cap = 64 << 20                     # conservative fallback (v7x per-TC)
    return max(16 << 20, (cap * 3) // 4)   # ~48 MiB on v7x, ~96 MiB on v5e/v6e


def lily_adapter_monoscale(x, w_lp, b_lp, hps, *, ne, mlp=False, tm=1024):
    """x: (B, N, in_dim); w_lp: (in_dim, hidden_dim); b_lp: (hidden_dim,);
    hps: (ne, hidden_dim, out_dim). Returns (B, N, out_dim)."""
    B, N, in_dim = x.shape
    hidden_dim = w_lp.shape[1]
    out_dim = hps.shape[-1]
    M = B * N

    # Grid-invariant expert reduction, hoisted out of the grid loop.
    combined = (jnp.sum(hps, axis=0) * (1.0 / ne)).astype(w_lp.dtype)
    b2d = b_lp.reshape(1, hidden_dim)
    x2d = x.reshape(M, in_dim)

    # --- M-tile sizing from the per-generation VMEM budget -------------------
    act_item = jnp.dtype(x.dtype).itemsize
    par_item = jnp.dtype(w_lp.dtype).itemsize
    # Params are resident across the grid; auto-pipelining still allocates 2
    # VMEM buffers per input by default.  (pipeline_mode=pl.Buffered(1) on the
    # grid-invariant params would reclaim half, but adapter params are tiny.)
    param_bytes = 2 * (in_dim * hidden_dim + hidden_dim
                       + hidden_dim * out_dim) * par_item
    # Per-output-row cost: double-buffered x / out tiles + f32 intermediates.
    row_bytes = (2 * (in_dim + out_dim) * act_item
                 + (hidden_dim + out_dim) * 4)
    budget = int(_vmem_budget_bytes())
    tm_cap = max(8, (budget - param_bytes) // row_bytes)

    tm_limit = int(min(tm, tm_cap))
    if M <= tm_limit:
        # Single tile: avoids per-step overhead on single-TC v5e/v6e.
        # TODO(synk): on 2-TC chips (v7x) an even 2-way split of small M would
        # feed the second TensorCore; needs a reliable core-count query.
        tm_eff = _round_up(M, 8)
    else:
        # Large M: MXU/lane-friendly tile; ragged edge block masked by Pallas.
        tm_eff = (tm_limit // 256) * 256
        if tm_eff == 0:
            tm_eff = max(8, (tm_limit // 8) * 8)
    grid_m = pl.cdiv(M, tm_eff)

    # NOTE: for best store throughput out_dim should be a multiple of 128
    # (true for real transformer dims); smaller out_dim falls back to masked
    # partial stores, which we accept rather than padding + re-slicing in HBM.

    kernel = functools.partial(_lily_kernel, apply_relu=bool(mlp))

    out2d = pl.pallas_call(
        kernel,
        out_shape=jax.ShapeDtypeStruct((M, out_dim), x.dtype),
        grid_spec=pltpu.PrefetchScalarGridSpec(
            num_scalar_prefetch=0,
            grid=(grid_m,),
            in_specs=[
                pl.BlockSpec((tm_eff, in_dim), lambda i: (i, 0)),        # x tile
                pl.BlockSpec((in_dim, hidden_dim), lambda i: (0, 0)),    # lp weight
                pl.BlockSpec((1, hidden_dim), lambda i: (0, 0)),         # lp bias
                pl.BlockSpec((hidden_dim, out_dim), lambda i: (0, 0)),   # combined_hp
            ],
            out_specs=pl.BlockSpec((tm_eff, out_dim), lambda i: (i, 0)),
        ),
        compiler_params=pltpu.CompilerParams(
            dimension_semantics=("parallel",),
            vmem_limit_bytes=budget),
    )(x2d, w_lp, b2d, combined)

    return out2d.reshape(B, N, out_dim)


def _reference(x, w_lp, b_lp, hps, *, ne, mlp=False):
    hidden = jnp.einsum("bni,ih->bnh", x, w_lp) + b_lp
    if mlp:
        hidden = jax.nn.relu(hidden)
    combined = jnp.sum(hps, axis=0) * (1.0 / ne)
    return jnp.einsum("bnh,ho->bno", hidden, combined)


if __name__ == "__main__":
    # Small shapes consistent with the module: ViT tokens (B, N, in_dim),
    # low-rank adapter (hidden_dim = rank), ne experts.
    in_dim, hidden_dim, out_dim = 32, 8, 32
    ne = 4

    key = jax.random.PRNGKey(0)
    kx, kw, kb, kh = jax.random.split(key, 4)

    w_lp = jax.random.normal(kw, (in_dim, hidden_dim), dtype=jnp.float32) * 0.05
    b_lp = jax.random.normal(kb, (hidden_dim,), dtype=jnp.float32) * 0.05
    hps = jax.random.normal(kh, (ne, hidden_dim, out_dim), dtype=jnp.float32) * 0.05

    # Two token counts: one a multiple of 8 and one ragged, exercising the
    # Pallas edge-block masking that replaced wrapper-side padding/slicing.
    for (B, N) in ((2, 8), (2, 7)):
        x = jax.random.normal(kx, (B, N, in_dim), dtype=jnp.float32)
        for mlp in (True, False):
            out = lily_adapter_monoscale(x, w_lp, b_lp, hps, ne=ne, mlp=mlp)
            out = jax.block_until_ready(out)
            ref = _reference(x, w_lp, b_lp, hps, ne=ne, mlp=mlp)
            assert out.shape == (B, N, out_dim)
            assert jnp.allclose(out, ref, atol=1e-4, rtol=1e-4), \
                f"mismatch mlp={mlp} B={B} N={N}"

    print("KERNEL_OK")
</pallas_src>

<mosaic_0001>
module attributes {stable_mosaic.version = 11 : i64} {
  func.func @_lily_kernel(%arg0: i32, %arg1: memref<16x32xf32, #tpu.memory_space<vmem>>, %arg2: memref<32x8xf32, #tpu.memory_space<vmem>>, %arg3: memref<1x8xf32, #tpu.memory_space<vmem>>, %arg4: memref<8x32xf32, #tpu.memory_space<vmem>>, %arg5: memref<16x32xf32, #tpu.memory_space<vmem>>) attributes {dimension_semantics = [#tpu.dimension_semantics<parallel>], iteration_bounds = array<i64: 1>, scalar_prefetch = 0 : i64, scratch_operands = 0 : i64, tpu.core_type = #tpu.core_type<tc>, window_params = [{transform_indices = @transform_0, window_bounds = array<i64: 16, 32>}, {pipeline_mode = #tpu.pipeline_mode<synchronous>, transform_indices = @transform_1, window_bounds = array<i64: 32, 8>}, {pipeline_mode = #tpu.pipeline_mode<synchronous>, transform_indices = @transform_2, window_bounds = array<i64: 1, 8>}, {pipeline_mode = #tpu.pipeline_mode<synchronous>, transform_indices = @transform_3, window_bounds = array<i64: 8, 32>}, {transform_indices = @transform_4, window_bounds = array<i64: 16, 32>}]} {
    %c0 = arith.constant 0 : index
    %c0_0 = arith.constant 0 : index
    %0 = vector.load %arg1[%c0, %c0_0] : memref<16x32xf32, #tpu.memory_space<vmem>>, vector<16x32xf32>
    %c0_1 = arith.constant 0 : index
    %c0_2 = arith.constant 0 : index
    %1 = vector.load %arg2[%c0_1, %c0_2] : memref<32x8xf32, #tpu.memory_space<vmem>>, vector<32x8xf32>
    %cst = arith.constant dense<0.000000e+00> : vector<16x8xf32>
    %2 = tpu.matmul %0, %1, %cst {dimension_numbers = #tpu.dot_dimension_numbers<[1], [0], [0], [1], [0, 0, 1, 1], [], []>} : vector<16x32xf32>, vector<32x8xf32>, vector<16x8xf32> -> vector<16x8xf32>
    %c0_3 = arith.constant 0 : index
    %c0_4 = arith.constant 0 : index
    %3 = vector.load %arg3[%c0_3, %c0_4] : memref<1x8xf32, #tpu.memory_space<vmem>>, vector<1x8xf32>
    %4 = vector.broadcast %3 : vector<1x8xf32> to vector<16x8xf32>
    %5 = arith.addf %2, %4 : vector<16x8xf32>
    %cst_5 = arith.constant 0.000000e+00 : f32
    %6 = vector.broadcast %cst_5 : f32 to vector<16x8xf32>
    %7 = arith.maximumf %5, %6 : vector<16x8xf32>
    %c0_6 = arith.constant 0 : index
    %c0_7 = arith.constant 0 : index
    %8 = vector.load %arg4[%c0_6, %c0_7] : memref<8x32xf32, #tpu.memory_space<vmem>>, vector<8x32xf32>
    %cst_8 = arith.constant dense<0.000000e+00> : vector<16x32xf32>
    %9 = tpu.matmul %7, %8, %cst_8 {dimension_numbers = #tpu.dot_dimension_numbers<[1], [0], [0], [1], [0, 0, 1, 1], [], []>} : vector<16x8xf32>, vector<8x32xf32>, vector<16x32xf32> -> vector<16x32xf32>
    %c0_9 = arith.constant 0 : index
    %c0_10 = arith.constant 0 : index
    %10 = vector.load %arg5[%c0_9, %c0_10] : memref<16x32xf32, #tpu.memory_space<vmem>>, vector<16x32xf32>
    tpu.vector_store %arg5[%c0_9, %c0_10], %9 {strides = array<i32>} : memref<16x32xf32, #tpu.memory_space<vmem>>, vector<16x32xf32>,
    return
  }
  func.func @transform_0(%arg0: i32) -> (i32, i32) {
    %c0_i32 = arith.constant 0 : i32
    %c0_i32_0 = arith.constant 0 : i32
    return %arg0, %c0_i32 : i32, i32
  }
  func.func @transform_1(%arg0: i32) -> (i32, i32) {
    %c0_i32 = arith.constant 0 : i32
    %c0_i32_0 = arith.constant 0 : i32
    %c0_i32_1 = arith.constant 0 : i32
    return %c0_i32, %c0_i32_0 : i32, i32
  }
  func.func @transform_2(%arg0: i32) -> (i32, i32) {
    %c0_i32 = arith.constant 0 : i32
    %c0_i32_0 = arith.constant 0 : i32
    %c0_i32_1 = arith.constant 0 : i32
    return %c0_i32, %c0_i32_0 : i32, i32
  }
  func.func @transform_3(%arg0: i32) -> (i32, i32) {
    %c0_i32 = arith.constant 0 : i32
    %c0_i32_0 = arith.constant 0 : i32
    %c0_i32_1 = arith.constant 0 : i32
    return %c0_i32, %c0_i32_0 : i32, i32
  }
  func.func @transform_4(%arg0: i32) -> (i32, i32) {
    %c0_i32 = arith.constant 0 : i32
    %c0_i32_0 = arith.constant 0 : i32
    return %arg0, %c0_i32 : i32, i32
  }
}

</mosaic_0001>

<bundles_post_ra>
// kernel: tpu_custom_call.1
= control target key start
LH: loop header
LB: loop body
LE: loop exit
PB: predicated region body
PF: predicated region fallthrough
CT: control target
= control target key end

     0   :  { %vm31_vm0 = vcmask 261120   ;;  %s330_s0 = inlined_call_operand.vmem [shape: f32[16,32], index: 0, kind: input, shape index: {}]   ;;  %s331_s1 = inlined_call_operand.vmem [shape: f32[32,8], index: 1, kind: input, shape index: {}]   ;;  %s332_s2 = inlined_call_operand.vmem [shape: f32[1,8], index: 2, kind: input, shape index: {}]   ;;  %s333_s3 = inlined_call_operand.vmem [shape: f32[8,32], index: 3, kind: input, shape index: {}]   ;;  %s334_s4 = inlined_call_operand.hbm [shape: f32[16,32], index: 4, kind: output, shape index: {}]  }
   0x1   :  { %v23_v0 = vld [vmem:[%s331_s1 + $0x18] sm:$0xff]  ;;  %v22_v1 = vld [vmem:[%s331_s1 + $0x10] sm:$0xff]  ;;  %v18_v2 = vld [vmem:[%s330_s0] sm:$0xff] }
   0x2   :  { %230 = vmatprep.subr.mxu0 %v23_v0  ;;  %v21_v3 = vld [vmem:[%s331_s1 + $0x8] sm:$0xff]  ;;  %238 = vmatprep.mubr.msk.f32.mxu0 %vm31_vm0, %v18_v2 }
   0x3   :  { %231 = vmatpush3.msra.mxu0 %v23_v0 }
   0x4   :  { %9 = vsyncpa [#allocation3], 0  ;;  %232 = vmatprep.subr.mxu0 %v22_v1  ;;  %v20_v4 = vld [vmem:[%s331_s1] sm:$0xff]  ;;  %v19_v5 = vld [vmem:[%s330_s0 + $0x8] sm:$0xff]  ;;  %vm116_vm1 = vcmask 64512   ;;  %s271_s0 = smov [#allocation2]  }
   0x5   :  { %233 = vmatpush3.msra.mxu0 %v22_v1  ;;  %v115_v6 = vld [vmem:[%s333_s3] sm:$0xff]  ;;  %s205_s1 = sshll.u32 %s271_s0, 4  ;;  %s206_s1 = int_to_ptr.vmem [resolvable:$true] %s205_s1 }
   0x6   :  { %234 = vmatprep.subr.mxu0 %v21_v3  ;;  %241 = vmatprep.subr.mxu1 %v115_v6  ;;  %v216_v7 = vld [vmem:[%s332_s2] ss:$0 sm:$0xff]  ;;  %s249_s3 = scalar_lea.vmem %s206_s1, 256  ;;  %p254_p1 = scmp.lt.s32.totalorder %s206_s1, %s206_s1 }
   0x7   :  { %235 = vmatpush3.msra.mxu0 %v21_v3  ;;  %242 = vmatpush3.msra.mxu1 %v115_v6  ;;  %p250_p0 = scmp.ne.s32.totalorder %s206_s1, %s249_s3  ;;  %p255_p2 = scmp.lt.s32.totalorder %s249_s3, %s249_s3 }
   0x8   :  { %236 = vmatprep.subr.mxu0 %v20_v4 }
   0x9   :  { %237 = vmatpush3.msra.mxu0 %v20_v4  ;;  %p256_p3 = por %p255_p2, %p254_p1 }
   0xa   :  { %239 = vmatmul.mubr.msk.f32.vlgmr.msra.gmra.mxu0 %vm31_vm0, %v19_v5 }
   0xb   :  { %p257_p4 = pnand %p256_p3, %p250_p0 }
  0xca   :  { %v240_v8 = vpop.f32.mrf.mxu0 }
  0xcb   :  { %v110_v9 = vadd.f32 %v240_v8, %v216_v7 }
  0xcc   :  { %v104_v10 = vpop.f32.mrf.mxu0 }
  0xcd   :  { %v105_v11 = vadd.f32 %v216_v7, %v104_v10  ;;  %v114_v13 = vmax.f32 %v110_v9, 0.0 }
  0xcf   :  { %v113_v12 = vmax.f32 %v105_v11, 0.0 }
  0xd1   :  { %243 = vmatprep.mubr.msk.f32.mxu1 %vm116_vm1, %v113_v12 }
  0xd2   :  { %244 = vmatmul.mubr.msk.f32.vlgmr.msra.gmra.mxu1 %vm116_vm1, %v114_v13 }
 0x192   :  { %v245_v14 = vpop.f32.mrf.mxu1 }
 0x193   :  { %199 = vst.msk [vmem:[#allocation2 + $0x8] sm:$0xff] %vm31_vm0, %v245_v14 }
 0x194   :  { %v189_v15 = vpop.f32.mrf.mxu1 }
 0x195   :  { %198 = vst.msk [vmem:[#allocation2] sm:$0xff] %vm31_vm0, %v189_v15 }
 0x196   :  { %260 = shalt.err (!%p257_p4)
}
 0x197   :  { %s272_s2 = smov 128   ;;  %s273_s5 = smov 8  }
 0x198   :  { %211 = dma.vmem_to_hbm [thread:$0]  %s206_s1, 256, %s334_s4, [#allocation3], %s272_s2, %s272_s2, %s273_s5  }
 0x199   :  { %269 = dma.done.wait [#allocation3], 256  }
 0x19a   :  { %270 = vsyncadd [#allocation3], 4294967040 }
 0x19b   :  { %215 = vsyncpa [#allocation3], 1 }

</bundles_post_ra>
